<compile_context>
chip_gen: v5e
topology: v5e:2x2
jax: 0.10.0
libtpu: 0.0.40
codegen_flags: <defaults>
</compile_context>

<pallas_src>
import functools

import jax
import jax.numpy as jnp
import numpy as np
from jax.experimental import pallas as pl
from jax.experimental.pallas import tpu as pltpu


def _ray_attention_kernel(B, L, eps,
                          x_ref, w_embed_ref, vecs_ref, w_qkv_ref, w_out_ref,
                          o_ref):
    D = w_out_ref.shape[-1]
    Din = x_ref.shape[-1]

    x = x_ref[...].reshape(B * L, Din)                              # f32

    # embed_fc (with bias): bf16 MXU inputs, f32 accumulation; bias add in f32.
    emb = jnp.dot(x.astype(jnp.bfloat16), w_embed_ref[...],
                  preferred_element_type=jnp.float32)
    emb = emb + vecs_ref[0:1, :]                                    # (B*L, D) f32
    residual = emb

    # LayerNorm over last dim (f32 elementwise).
    mu = jnp.mean(emb, axis=-1, keepdims=True)
    var = jnp.mean((emb - mu) * (emb - mu), axis=-1, keepdims=True)
    xn = (emb - mu) * jax.lax.rsqrt(var + eps) * vecs_ref[1:2, :] + vecs_ref[2:3, :]

    # Fused Q|K|V projection: (B*L, D) @ (D, 3D); scaling folded into Wq block.
    qkv = jnp.dot(xn.astype(jnp.bfloat16), w_qkv_ref[...],
                  preferred_element_type=jnp.float32)               # (B*L, 3D)
    q = qkv[:, 0 * D:1 * D].reshape(B, L, D)
    k = qkv[:, 1 * D:2 * D].reshape(B, L, D)
    v = qkv[:, 2 * D:3 * D].reshape(B, L, D)

    # Scores: contraction over the last dims (no explicit transpose of K).
    s = jnp.einsum("bqd,bkd->bqk",
                   q.astype(jnp.bfloat16), k.astype(jnp.bfloat16),
                   preferred_element_type=jnp.float32)              # (B, L, L)

    # Softmax (f32); reciprocal of the denominator on the EUP.
    m = jnp.max(s, axis=-1, keepdims=True)
    e = jnp.exp(s - m)
    attn = e * pl.reciprocal(jnp.sum(e, axis=-1, keepdims=True), approx=True)
    # dropout is identity in eval mode

    out = jnp.einsum("bqk,bkd->bqd",
                     attn.astype(jnp.bfloat16), v.astype(jnp.bfloat16),
                     preferred_element_type=jnp.float32)            # (B, L, D)
    out = jnp.dot(out.reshape(B * L, D).astype(jnp.bfloat16), w_out_ref[...],
                  preferred_element_type=jnp.float32)
    o_ref[...] = (out + residual).reshape(B, L, D)


def ray_attention_forward(x, params, *, eps=1e-6):
    """x: (B, L, D_in). Returns (B, L, D) with D = embed_dim = D_in."""
    x = x.astype(jnp.float32)
    B, L, Din = x.shape
    D = params["w_out"].shape[-1]
    scaling = float(D) ** (-0.5)          # head_dim ** -0.5 with num_head = 1

    # Host-side weight prep: fold scaling into Wq, fuse Q|K|V, cast to bf16,
    # pack small per-feature vectors into a single (3, D) array.
    w_embed = params["w_embed"].astype(jnp.bfloat16)                # (Din, D)
    w_qkv = jnp.concatenate(
        [params["wq"] * scaling, params["wk"], params["wv"]], axis=1
    ).astype(jnp.bfloat16)                                          # (D, 3D)
    w_out = params["w_out"].astype(jnp.bfloat16)                    # (D, D)
    vecs = jnp.stack(
        [params["b_embed"], params["ln_gamma"], params["ln_beta"]], axis=0
    ).astype(jnp.float32)                                           # (3, D)

    kernel = functools.partial(_ray_attention_kernel, B, L, eps)
    vmem = pl.BlockSpec(memory_space=pltpu.MemorySpace.VMEM)

    return pl.pallas_call(
        kernel,
        out_shape=jax.ShapeDtypeStruct((B, L, D), jnp.float32),
        in_specs=[vmem, vmem, vmem, vmem, vmem],
        out_specs=vmem,
    )(x, w_embed, vecs, w_qkv, w_out)


def _reference(x, params, eps=1e-6):
    """Pure-JAX f32 reference for validation (matches the PyTorch module)."""
    D = params["w_out"].shape[-1]
    scaling = float(D) ** (-0.5)
    emb = x @ params["w_embed"] + params["b_embed"]
    mu = jnp.mean(emb, -1, keepdims=True)
    var = jnp.mean((emb - mu) ** 2, -1, keepdims=True)
    xn = (emb - mu) / jnp.sqrt(var + eps) * params["ln_gamma"] + params["ln_beta"]
    q = xn @ params["wq"]
    k = xn @ params["wk"]
    v = xn @ params["wv"]
    s = jnp.einsum("bqd,bkd->bqk", q, k) * scaling
    a = jax.nn.softmax(s, axis=-1)
    out = jnp.einsum("bqk,bkd->bqd", a, v) @ params["w_out"]
    return out + emb


if __name__ == "__main__":
    B, L, Din = 2, 8, 32
    D = Din                               # embed_dim=None => embed_dim = input_dim

    key = jax.random.PRNGKey(0)
    ks = jax.random.split(key, 9)
    x = jax.random.normal(ks[0], (B, L, Din), jnp.float32)

    params = {
        "w_embed": jax.random.normal(ks[1], (Din, D), jnp.float32) * 0.1,
        "b_embed": jax.random.normal(ks[2], (D,), jnp.float32) * 0.1,
        "wq": jax.random.normal(ks[3], (D, D), jnp.float32) * 0.05,
        "wk": jax.random.normal(ks[4], (D, D), jnp.float32) * 0.05,
        "wv": jax.random.normal(ks[5], (D, D), jnp.float32) * 0.05,
        "w_out": jax.random.normal(ks[6], (D, D), jnp.float32) * 0.05,
        "ln_gamma": 1.0 + 0.1 * jax.random.normal(ks[7], (D,), jnp.float32),
        "ln_beta": 0.1 * jax.random.normal(ks[8], (D,), jnp.float32),
    }

    out = ray_attention_forward(x, params)
    out = jax.block_until_ready(out)

    ref = _reference(x, params)
    # bf16 matmul operands + approx reciprocal => loosened tolerance vs. pure f32.
    np.testing.assert_allclose(np.asarray(out), np.asarray(ref), rtol=2e-2, atol=2e-2)

    print("KERNEL_OK")
</pallas_src>

<mosaic_0001>
module attributes {stable_mosaic.version = 11 : i64} {
  func.func @_ray_attention_kernel(%arg0: memref<2x8x32xf32, #tpu.memory_space<vmem>>, %arg1: memref<32x32xbf16, #tpu.memory_space<vmem>>, %arg2: memref<3x32xf32, #tpu.memory_space<vmem>>, %arg3: memref<32x96xbf16, #tpu.memory_space<vmem>>, %arg4: memref<32x32xbf16, #tpu.memory_space<vmem>>, %arg5: memref<2x8x32xf32, #tpu.memory_space<vmem>>) attributes {dimension_semantics = [], scalar_prefetch = 0 : i64, scratch_operands = 0 : i64, tpu.core_type = #tpu.core_type<tc>} {
    %c0 = arith.constant 0 : index
    %c0_0 = arith.constant 0 : index
    %c0_1 = arith.constant 0 : index
    %0 = vector.load %arg0[%c0, %c0_0, %c0_1] : memref<2x8x32xf32, #tpu.memory_space<vmem>>, vector<2x8x32xf32>
    %1 = vector.shape_cast %0 : vector<2x8x32xf32> to vector<16x32xf32>
    %2 = arith.truncf %1 : vector<16x32xf32> to vector<16x32xbf16>
    %c0_2 = arith.constant 0 : index
    %c0_3 = arith.constant 0 : index
    %3 = vector.load %arg1[%c0_2, %c0_3] : memref<32x32xbf16, #tpu.memory_space<vmem>>, vector<32x32xbf16>
    %cst = arith.constant dense<0.000000e+00> : vector<16x32xf32>
    %4 = tpu.matmul %2, %3, %cst {dimension_numbers = #tpu.dot_dimension_numbers<[1], [0], [0], [1], [0, 0, 1, 1], [], []>} : vector<16x32xbf16>, vector<32x32xbf16>, vector<16x32xf32> -> vector<16x32xf32>
    %c0_4 = arith.constant 0 : index
    %c0_5 = arith.constant 0 : index
    %5 = vector.load %arg2[%c0_4, %c0_5] : memref<3x32xf32, #tpu.memory_space<vmem>>, vector<1x32xf32>
    %6 = vector.broadcast %5 : vector<1x32xf32> to vector<16x32xf32>
    %7 = arith.addf %4, %6 : vector<16x32xf32>
    %cst_6 = arith.constant dense<0.000000e+00> : vector<16xf32>
    %8 = vector.multi_reduction <add>, %7, %cst_6 [1] : vector<16x32xf32> to vector<16xf32>
    %9 = vector.shape_cast %8 : vector<16xf32> to vector<16x1xf32>
    %cst_7 = arith.constant 3.200000e+01 : f32
    %10 = vector.broadcast %cst_7 : f32 to vector<16x1xf32>
    %11 = arith.divf %9, %10 : vector<16x1xf32>
    %12 = vector.broadcast %11 : vector<16x1xf32> to vector<16x32xf32>
    %13 = arith.subf %7, %12 : vector<16x32xf32>
    %14 = vector.broadcast %11 : vector<16x1xf32> to vector<16x32xf32>
    %15 = arith.subf %7, %14 : vector<16x32xf32>
    %16 = arith.mulf %13, %15 : vector<16x32xf32>
    %cst_8 = arith.constant dense<0.000000e+00> : vector<16xf32>
    %17 = vector.multi_reduction <add>, %16, %cst_8 [1] : vector<16x32xf32> to vector<16xf32>
    %18 = vector.shape_cast %17 : vector<16xf32> to vector<16x1xf32>
    %cst_9 = arith.constant 3.200000e+01 : f32
    %19 = vector.broadcast %cst_9 : f32 to vector<16x1xf32>
    %20 = arith.divf %18, %19 : vector<16x1xf32>
    %21 = vector.broadcast %11 : vector<16x1xf32> to vector<16x32xf32>
    %22 = arith.subf %7, %21 : vector<16x32xf32>
    %cst_10 = arith.constant 9.99999997E-7 : f32
    %23 = vector.broadcast %cst_10 : f32 to vector<16x1xf32>
    %24 = arith.addf %20, %23 : vector<16x1xf32>
    %25 = math.rsqrt %24 : vector<16x1xf32>
    %26 = vector.broadcast %25 : vector<16x1xf32> to vector<16x32xf32>
    %27 = arith.mulf %22, %26 : vector<16x32xf32>
    %c1 = arith.constant 1 : index
    %c0_11 = arith.constant 0 : index
    %28 = vector.load %arg2[%c1, %c0_11] : memref<3x32xf32, #tpu.memory_space<vmem>>, vector<1x32xf32>
    %29 = vector.broadcast %28 : vector<1x32xf32> to vector<16x32xf32>
    %30 = arith.mulf %27, %29 : vector<16x32xf32>
    %c2 = arith.constant 2 : index
    %c0_12 = arith.constant 0 : index
    %31 = vector.load %arg2[%c2, %c0_12] : memref<3x32xf32, #tpu.memory_space<vmem>>, vector<1x32xf32>
    %32 = vector.broadcast %31 : vector<1x32xf32> to vector<16x32xf32>
    %33 = arith.addf %30, %32 : vector<16x32xf32>
    %34 = arith.truncf %33 : vector<16x32xf32> to vector<16x32xbf16>
    %c0_13 = arith.constant 0 : index
    %c0_14 = arith.constant 0 : index
    %35 = vector.load %arg3[%c0_13, %c0_14] : memref<32x96xbf16, #tpu.memory_space<vmem>>, vector<32x96xbf16>
    %cst_15 = arith.constant dense<0.000000e+00> : vector<16x96xf32>
    %36 = tpu.matmul %34, %35, %cst_15 {dimension_numbers = #tpu.dot_dimension_numbers<[1], [0], [0], [1], [0, 0, 1, 1], [], []>} : vector<16x32xbf16>, vector<32x96xbf16>, vector<16x96xf32> -> vector<16x96xf32>
    %37 = vector.extract_strided_slice %36 {offsets = [0, 0], sizes = [16, 32], strides = [1, 1]} : vector<16x96xf32> to vector<16x32xf32>
    %38 = vector.shape_cast %37 : vector<16x32xf32> to vector<2x8x32xf32>
    %39 = vector.extract_strided_slice %36 {offsets = [0, 32], sizes = [16, 32], strides = [1, 1]} : vector<16x96xf32> to vector<16x32xf32>
    %40 = vector.shape_cast %39 : vector<16x32xf32> to vector<2x8x32xf32>
    %41 = vector.extract_strided_slice %36 {offsets = [0, 64], sizes = [16, 32], strides = [1, 1]} : vector<16x96xf32> to vector<16x32xf32>
    %42 = vector.shape_cast %41 : vector<16x32xf32> to vector<2x8x32xf32>
    %43 = arith.truncf %38 : vector<2x8x32xf32> to vector<2x8x32xbf16>
    %44 = arith.truncf %40 : vector<2x8x32xf32> to vector<2x8x32xbf16>
    "tpu.trace_start"() <{level = 10 : i32, message = "bqd,bkd->bqk"}> : () -> ()
    %cst_16 = arith.constant dense<0.000000e+00> : vector<2x8x8xf32>
    %45 = tpu.matmul %43, %44, %cst_16 {dimension_numbers = #tpu.dot_dimension_numbers<[2], [2], [1], [1], [0, 0, 0, 1, 1, 1], [0], [0]>} : vector<2x8x32xbf16>, vector<2x8x32xbf16>, vector<2x8x8xf32> -> vector<2x8x8xf32>
    "tpu.trace_stop"() : () -> ()
    %cst_17 = arith.constant dense<0xFF800000> : vector<2x8xf32>
    %46 = vector.multi_reduction <maximumf>, %45, %cst_17 [2] : vector<2x8x8xf32> to vector<2x8xf32>
    %47 = vector.shape_cast %46 : vector<2x8xf32> to vector<2x8x1xf32>
    %48 = vector.broadcast %47 : vector<2x8x1xf32> to vector<2x8x8xf32>
    %49 = arith.subf %45, %48 : vector<2x8x8xf32>
    %50 = math.exp %49 : vector<2x8x8xf32>
    %cst_18 = arith.constant dense<0.000000e+00> : vector<2x8xf32>
    %51 = vector.multi_reduction <add>, %50, %cst_18 [2] : vector<2x8x8xf32> to vector<2x8xf32>
    %52 = vector.shape_cast %51 : vector<2x8xf32> to vector<2x8x1xf32>
    %53 = tpu.reciprocal %52 {approx = true} : vector<2x8x1xf32> -> vector<2x8x1xf32>
    %54 = vector.broadcast %53 : vector<2x8x1xf32> to vector<2x8x8xf32>
    %55 = arith.mulf %50, %54 : vector<2x8x8xf32>
    %56 = arith.truncf %55 : vector<2x8x8xf32> to vector<2x8x8xbf16>
    %57 = arith.truncf %42 : vector<2x8x32xf32> to vector<2x8x32xbf16>
    "tpu.trace_start"() <{level = 10 : i32, message = "bqk,bkd->bqd"}> : () -> ()
    %cst_19 = arith.constant dense<0.000000e+00> : vector<2x8x32xf32>
    %58 = tpu.matmul %56, %57, %cst_19 {dimension_numbers = #tpu.dot_dimension_numbers<[2], [1], [1], [2], [0, 0, 0, 1, 1, 2], [0], [0]>} : vector<2x8x8xbf16>, vector<2x8x32xbf16>, vector<2x8x32xf32> -> vector<2x8x32xf32>
    "tpu.trace_stop"() : () -> ()
    %59 = vector.shape_cast %58 : vector<2x8x32xf32> to vector<16x32xf32>
    %60 = arith.truncf %59 : vector<16x32xf32> to vector<16x32xbf16>
    %c0_20 = arith.constant 0 : index
    %c0_21 = arith.constant 0 : index
    %61 = vector.load %arg4[%c0_20, %c0_21] : memref<32x32xbf16, #tpu.memory_space<vmem>>, vector<32x32xbf16>
    %cst_22 = arith.constant dense<0.000000e+00> : vector<16x32xf32>
    %62 = tpu.matmul %60, %61, %cst_22 {dimension_numbers = #tpu.dot_dimension_numbers<[1], [0], [0], [1], [0, 0, 1, 1], [], []>} : vector<16x32xbf16>, vector<32x32xbf16>, vector<16x32xf32> -> vector<16x32xf32>
    %63 = arith.addf %62, %7 : vector<16x32xf32>
    %64 = vector.shape_cast %63 : vector<16x32xf32> to vector<2x8x32xf32>
    %c0_23 = arith.constant 0 : index
    %c0_24 = arith.constant 0 : index
    %c0_25 = arith.constant 0 : index
    %65 = vector.load %arg5[%c0_23, %c0_24, %c0_25] : memref<2x8x32xf32, #tpu.memory_space<vmem>>, vector<2x8x32xf32>
    tpu.vector_store %arg5[%c0_23, %c0_24, %c0_25], %64 {strides = array<i32>} : memref<2x8x32xf32, #tpu.memory_space<vmem>>, vector<2x8x32xf32>,
    return
  }
}

</mosaic_0001>

<bundles_post_ra>
// kernel: tpu_custom_call.1
= control target key start
LH: loop header
LB: loop body
LE: loop exit
PB: predicated region body
PF: predicated region fallthrough
CT: control target
= control target key end

     0   :  { %10 = vsyncpa [#allocation3], 0  ;;  %s731_s0 = inlined_call_operand.hbm [shape: f32[2,8,32], index: 0, kind: input, shape index: {}]   ;;  %s732_s1 = inlined_call_operand.hbm [shape: bf16[32,32], index: 1, kind: input, shape index: {}]   ;;  %s733_s2 = inlined_call_operand.hbm [shape: f32[3,32], index: 2, kind: input, shape index: {}]   ;;  %s734_s3 = inlined_call_operand.hbm [shape: bf16[32,96], index: 3, kind: input, shape index: {}]   ;;  %s735_s4 = inlined_call_operand.hbm [shape: bf16[32,32], index: 4, kind: input, shape index: {}]   ;;  %s736_s5 = inlined_call_operand.hbm [shape: f32[2,8,32], index: 5, kind: output, shape index: {}]  }
   0x1   :  { %11 = vsyncpa [#allocation6], 0 }
   0x2   :  { %12 = vsyncpa [#allocation9], 0  ;;  %s31_s20 = sshll.u32 %s732_s1, 4  ;;  %s32_s20 = int_to_ptr.hbm [resolvable:$true] %s31_s20 }
   0x3   :  { %13 = vsyncpa [#allocation4], 0  ;;  %s623_s21 = smov [#allocation5]   ;;  %s55_s25 = sshll.u32 %s734_s3, 4  ;;  %s56_s25 = int_to_ptr.hbm [resolvable:$true] %s55_s25 }
   0x4   :  { %s33_s22 = sshll.u32 %s623_s21, 4  ;;  %s624_s26 = smov 64   ;;  %s34_s22 = int_to_ptr.vmem [resolvable:$true] %s33_s22 }
   0x5   :  { %s625_s27 = smov 4   ;;  %s626_s28 = smov [#allocation8]  }
   0x6   :  { %39 = dma.hbm_to_vmem [thread:$0]  %s32_s20, 256, %s34_s22, [#allocation6], %s624_s26, %s624_s26, %s625_s27  }
   0x7   :  { %s57_s29 = sshll.u32 %s626_s28, 4  ;;  %s18_s6 = sshll.u32 %s731_s0, 4  ;;  %s58_s29 = int_to_ptr.vmem [resolvable:$true] %s57_s29  ;;  %s19_s6 = int_to_ptr.hbm [resolvable:$true] %s18_s6 }
   0x8   :  { %63 = dma.hbm_to_vmem [thread:$0]  %s56_s25, 256, %s58_s29, [#allocation9], %s624_s26, %s624_s26, %s625_s27  }
   0x9   :  { %s627_s3 = smov [#allocation2]   ;;  %s45_s10 = sshll.u32 %s733_s2, 4  ;;  %s46_s10 = int_to_ptr.hbm [resolvable:$true] %s45_s10 }
   0xa   :  { %s20_s7 = sshll.u32 %s627_s3, 4  ;;  %s628_s11 = smov 128   ;;  %s21_s7 = int_to_ptr.vmem [resolvable:$true] %s20_s7 }
   0xb   :  { %s629_s12 = smov 8   ;;  %s630_s0 = smov [#allocation7]  }
   0xc   :  { %26 = dma.hbm_to_vmem [thread:$0]  %s19_s6, 256, %s21_s7, [#allocation3], %s628_s11, %s628_s11, %s629_s12  }
   0xd   :  { %s47_s13 = sshll.u32 %s630_s0, 4  ;;  %s68_s16 = sshll.u32 %s735_s4, 4  ;;  %s48_s13 = int_to_ptr.vmem [resolvable:$true] %s47_s13  ;;  %s69_s16 = int_to_ptr.hbm [resolvable:$true] %s68_s16 }
   0xe   :  { %50 = dma.hbm_to_vmem [thread:$0]  %s46_s10, 64, %s48_s13, [#allocation6]  }
   0xf   :  { %s631_s17 = smov [#allocation10]  }
  0x10   :  { %s70_s18 = sshll.u32 %s631_s17, 4  ;;  %s71_s18 = int_to_ptr.vmem [resolvable:$true] %s70_s18 }
  0x11   :  { %76 = dma.hbm_to_vmem [thread:$0]  %s69_s16, 256, %s71_s18, [#allocation9], %s624_s26, %s624_s26, %s625_s27  }
  0x12   :  { %615 = dma.done.wait [#allocation3], 256  }
  0x13   :  { %616 = vsyncadd [#allocation3], 4294967040 }
  0x14   :  { %617 = dma.done.wait [#allocation6], 320  }
  0x15   :  { %618 = vsyncadd [#allocation6], 4294966976 }
  0x16   :  { %619 = dma.done.wait [#allocation9], 512  }
  0x17   :  { %620 = vsyncadd [#allocation9], 4294966784  ;;  %v437_v0 = vld [vmem:[#allocation5 + $0x8] sm:$0xff]  ;;  %v436_v1 = vld [vmem:[#allocation5] sm:$0xff]  ;;  %vm119_vm0 = vcmask 261120   ;;  %v632_v12 = vmov 32.0  }
  0x18   :  { %v98_v2 = vld [vmem:[#allocation2] sm:$0xff]  ;;  %129 = vmatpush.bf16.msra.mxu0 %v437_v0  ;;  %v99_v3 = vld [vmem:[#allocation2 + $0x8] sm:$0xff]  ;;  %457 = vrcp.f32 %v632_v12  ;;  %s633_s2 = smov 96   ;;  %vm280_vm8 = vcmask 64512   ;;  %vm310_vm9 = vcmask 1043456   ;;  %s634_s4 = smov [#allocation11]  }
  0x19   :  { %v100_v4 = vpack.c.bf16 %v99_v3, %v98_v2  ;;  %v454_v5 = vld [vmem:[#allocation7] ss:$0 sm:$0xff]  ;;  %v439_v29 = vld [vmem:[#allocation8 + $0x8] sm:$0xff]  ;;  %v438_v31 = vld [vmem:[#allocation8] sm:$0xff]  ;;  %s388_s19 = sshll.u32 %s634_s4, 4  ;;  %s390_s22 = sshll.u32 %s736_s5, 4  ;;  %s389_s19 = int_to_ptr.vmem [resolvable:$true] %s388_s19  ;;  %s391_s22 = int_to_ptr.hbm [resolvable:$true] %s390_s22 }
  0x1a   :  { %222 = vmatpush.bf16.msra.mxu1 %v439_v29  ;;  %v455_v50 = vld [vmem:[#allocation7 + $0x1] ss:$0 sm:$0xff]  ;;  %v456_v55 = vld [vmem:[#allocation7 + $0x2] ss:$0 sm:$0xff] }
  0x1c   :  { %130 = vmatpush.bf16.msra.mxu0 %v436_v1 }
  0x1e   :  { %v458_v13 = vpop.eup %457  ;;  %223 = vmatpush.bf16.msra.mxu1 %v438_v31 }
  0x1f   :  { %413 = vmatmul.msk.bf16.vlgmr.msra.gmra.mxu0 %vm119_vm0, %v100_v4  ;;  %v144_v14 = vmul.f32 32.0, %v458_v13  ;;  %vm148_vm1 = vweird.f32 %v458_v13 }
  0x21   :  { %v145_v15 = vsub.f32 1.0, %v144_v14 }
  0x23   :  { %v146_v16 = vmul.f32 %v458_v13, %v145_v15 }
  0x25   :  { %v147_v17 = vadd.f32 %v458_v13, %v146_v16 }
  0x27   :  { %v149_v18 = vsel %vm148_vm1, %v458_v13, %v147_v17 }
  0x9c   :  { %v132_v6 = vpop.f32.mrf.mxu0 }
  0x9d   :  { %v693_v7 = vadd.f32 %v454_v5, %v132_v6 }
  0x9f   :  { %v137_v8 = vsel %vm119_vm0, %v693_v7, 0.0 }
  0xa0   :  { %138 = vadd.xlane.f32.xlu0 %v137_v8 }
  0xa4   :  { %v134_v9 = vpop.f32.mrf.mxu0 }
  0xa5   :  { %v697_v10 = vadd.f32 %v454_v5, %v134_v9 }
  0xa7   :  { %v140_v11 = vsel %vm119_vm0, %v697_v10, 0.0 }
  0xa8   :  { %141 = vadd.xlane.f32.xlu0 %v140_v11 }
 0x113   :  { %v139_v19 = vpop.xlane.xlu0 %138 }
 0x114   :  { %v150_v20 = vmul.f32 %v149_v18, %v139_v19 }
 0x116   :  { %v152_v21 = vsub.f32 %v693_v7, %v150_v20 }
 0x118   :  { %v154_v22 = vmul.f32 %v152_v21, %v152_v21 }
 0x11a   :  { %v156_v23 = vsel %vm119_vm0, %v154_v22, 0.0 }
 0x11b   :  { %157 = vadd.xlane.f32.xlu1 %v156_v23  ;;  %v142_v24 = vpop.xlane.xlu0 %141 }
 0x11c   :  { %v151_v25 = vmul.f32 %v149_v18, %v142_v24 }
 0x11e   :  { %v153_v26 = vsub.f32 %v697_v10, %v151_v25 }
 0x120   :  { %v155_v27 = vmul.f32 %v153_v26, %v153_v26 }
 0x122   :  { %v159_v28 = vsel %vm119_vm0, %v155_v27, 0.0 }
 0x123   :  { %160 = vadd.xlane.f32.xlu1 %v159_v28 }
 0x18e   :  { %v158_v30 = vpop.xlane.xlu1 %157 }
 0x18f   :  { %v162_v32 = vmul.f32 %v158_v30, %v149_v18 }
 0x191   :  { %v164_v33 = vadd.f32 1e-06, %v162_v32 }
 0x193   :  { %459 = vrsqrt.f32 %v164_v33  ;;  %vm172_vm3 = vweird.f32 %v164_v33 }
 0x196   :  { %v161_v34 = vpop.xlane.xlu1 %160 }
 0x197   :  { %v163_v35 = vmul.f32 %v161_v34, %v149_v18 }
 0x199   :  { %v460_v36 = vpop.eup %459  ;;  %v165_v37 = vadd.f32 1e-06, %v163_v35 }
 0x19a   :  { %v167_v38 = vmul.f32 %v460_v36, %v164_v33  ;;  %vm173_vm2 = vweird.f32 %v460_v36 }
 0x19b   :  { %461 = vrsqrt.f32 %v165_v37  ;;  %vm174_vm4 = vmor %vm172_vm3, %vm173_vm2  ;;  %vm182_vm6 = vweird.f32 %v165_v37 }
 0x19c   :  { %v168_v39 = vmul.f32 %v460_v36, %v167_v38  ;;  %v441_v38 = vld [vmem:[#allocation10 + $0x8] sm:$0xff] }
 0x19e   :  { %v169_v40 = vmul.f32 0.5, %v168_v39  ;;  %v440_v39 = vld [vmem:[#allocation10] sm:$0xff] }
 0x1a0   :  { %v170_v41 = vsub.f32 1.5, %v169_v40 }
 0x1a1   :  { %v462_v42 = vpop.eup %461 }
 0x1a2   :  { %v171_v43 = vmul.f32 %v460_v36, %v170_v41  ;;  %v177_v44 = vmul.f32 %v462_v42, %v165_v37  ;;  %vm183_vm5 = vweird.f32 %v462_v42 }
 0x1a3   :  { %vm184_vm7 = vmor %vm182_vm6, %vm183_vm5 }
 0x1a4   :  { %v178_v45 = vmul.f32 %v462_v42, %v177_v44  ;;  %v175_v46 = vsel %vm174_vm4, %v460_v36, %v171_v43 }
 0x1a5   :  { %v186_v49 = vmul.f32 %v175_v46, %v152_v21 }
 0x1a6   :  { %v179_v47 = vmul.f32 0.5, %v178_v45 }
 0x1a7   :  { %v190_v54 = vmul.f32 %v455_v50, %v186_v49 }
 0x1a8   :  { %v180_v48 = vsub.f32 1.5, %v179_v47 }
 0x1a9   :  { %v194_v57 = vadd.f32 %v456_v55, %v190_v54 }
 0x1aa   :  { %v181_v51 = vmul.f32 %v462_v42, %v180_v48 }
 0x1ac   :  { %v185_v52 = vsel %vm184_vm7, %v462_v42, %v181_v51 }
 0x1ad   :  { %v187_v53 = vmul.f32 %v185_v52, %v153_v26 }
 0x1af   :  { %v191_v56 = vmul.f32 %v455_v50, %v187_v53 }
 0x1b1   :  { %v195_v58 = vadd.f32 %v456_v55, %v191_v56 }
 0x1b3   :  { %v196_v59 = vpack.c.bf16 %v195_v58, %v194_v57 }
 0x1b5   :  { %422 = vmatmul.msk.bf16.vlgmr.msra.gmra.mxu1 %vm119_vm0, %v196_v59 }
 0x232   :  { %v225_v60 = vpop.f32.mrf.mxu1 }
 0x233   :  { %v230_v61 = vpack.c.bf16 %v225_v60, %v225_v60 }
 0x235   :  { %v233_v62 = vunpack.c.l.b16 %v230_v61 }
 0x237   :  { %v234_v63 = vpack.c.b16 %v233_v62, %v233_v62 }
 0x239   :  { %235 = vrot.lane.b32.xlu2 %v234_v63, %s633_s2 }
 0x23a   :  { %v227_v0 = vpop.f32.mrf.mxu1 }
 0x23b   :  { %v231_v1 = vpack.c.bf16 %v227_v0, %v227_v0 }
 0x23d   :  { %v257_v2 = vunpack.c.l.b16 %v231_v1 }
 0x23f   :  { %v258_v3 = vpack.c.b16 %v257_v2, %v257_v2 }
 0x241   :  { %259 = vrot.lane.b32.xlu2 %v258_v3, %s633_s2 }
 0x293   :  { %v236_v4 = vpop.permute.xlu2 %235 }
 0x294   :  { %v241_v5 = vsel %vm119_vm0, %v236_v4, 0 }
 0x295   :  { %250 = vmatpush.bf16.xpose.msra.mxu2 %v241_v5 }
 0x29b   :  { %v260_v6 = vpop.permute.xlu2 %259 }
 0x29c   :  { %423 = vmatmul.msk.bf16.vlgmr.msra.gmra.mxu2 %vm119_vm0, %v230_v61  ;;  %v265_v8 = vsel %vm119_vm0, %v260_v6, 0 }
 0x29d   :  { %274 = vmatpush.bf16.xpose.msra.mxu3 %v265_v8  ;;  %374 = vmatpush.bf16.msrb.mxu2 %v441_v38 }
 0x2a1   :  { %375 = vmatpush.bf16.msrb.mxu2 %v440_v39 }
 0x2a4   :  { %424 = vmatmul.msk.bf16.vlgmr.msra.gmra.mxu3 %vm119_vm0, %v231_v1 }
 0x31f   :  { %v252_v9 = vpop.f32.mrf.mxu2 }
 0x320   :  { %v281_v11 = vsel %vm280_vm8, %v252_v9, -inf }
 0x321   :  { %282 = vmax.xlane.f32.xlu0 %v281_v11 }
 0x327   :  { %v254_v12 = vpop.f32.mrf.mxu2  ;;  %v276_v13 = vpop.f32.mrf.mxu3 }
 0x328   :  { %v284_v14 = vsel %vm280_vm8, %v276_v13, -inf }
 0x329   :  { %285 = vmax.xlane.f32.xlu1 %v284_v14 }
 0x32f   :  { %v278_v15 = vpop.f32.mrf.mxu3 }
 0x342   :  { %305 = vrot.lane.b32.xlu1 %v234_v63, %s624_s26 }
 0x394   :  { %v283_v16 = vpop.xlane.xlu0 %282 }
 0x395   :  { %v287_v17 = vsub.f32 %v252_v9, %v283_v16 }
 0x397   :  { %v289_v18 = vmul.f32 1.442695, %v287_v17 }
 0x399   :  { %463 = vpow2.f32 %v289_v18 }
 0x39c   :  { %v286_v19 = vpop.xlane.xlu1 %285 }
 0x39d   :  { %v288_v20 = vsub.f32 %v276_v13, %v286_v19 }
 0x39f   :  { %v464_v21 = vpop.eup %463  ;;  %v291_v22 = vmul.f32 1.442695, %v288_v20 }
 0x3a0   :  { %v293_v23 = vsel %vm280_vm8, %v464_v21, 0.0 }
 0x3a1   :  { %465 = vpow2.f32 %v291_v22  ;;  %294 = vadd.xlane.f32.xlu2 %v293_v23 }
 0x3a7   :  { %v466_v24 = vpop.eup %465 }
 0x3a8   :  { %v296_v25 = vsel %vm280_vm8, %v466_v24, 0.0 }
 0x3a9   :  { %297 = vadd.xlane.f32.xlu0 %v296_v25 }
 0x3b4   :  { %v306_v26 = vpop.permute.xlu1 %305 }
 0x3b5   :  { %v312_v27 = vsel %vm310_vm9, %v306_v26, 0 }
 0x3b6   :  { %321 = vmatpush.bf16.msrb.mxu0 %v312_v27 }
 0x3bd   :  { %327 = vrot.lane.b32.xlu0 %v258_v3, %s624_s26 }
 0x414   :  { %v295_v28 = vpop.xlane.xlu2 %294 }
 0x415   :  { %467 = vrcp.f32 %v295_v28 }
 0x41b   :  { %v468_v29 = vpop.eup %467 }
 0x41c   :  { %v301_v30 = vmul.f32 %v468_v29, %v464_v21  ;;  %v298_v32 = vpop.xlane.xlu0 %297 }
 0x41d   :  { %469 = vrcp.f32 %v298_v32 }
 0x41e   :  { %v303_v31 = vpack.c.bf16 %v301_v30, %v301_v30 }
 0x420   :  { %425 = vmatmul.msk.bf16.vlgmr.msrb.gmra.mxu0 %vm280_vm8, %v303_v31 }
 0x423   :  { %v470_v33 = vpop.eup %469 }
 0x424   :  { %v302_v34 = vmul.f32 %v470_v33, %v466_v24 }
 0x426   :  { %v304_v37 = vpack.c.bf16 %v302_v34, %v302_v34 }
 0x42f   :  { %v328_v35 = vpop.permute.xlu0 %327 }
 0x430   :  { %v333_v36 = vsel %vm310_vm9, %v328_v35, 0 }
 0x431   :  { %342 = vmatpush.bf16.msrb.mxu1 %v333_v36 }
 0x434   :  { %426 = vmatmul.msk.bf16.vlgmr.msrb.gmra.mxu1 %vm280_vm8, %v304_v37 }
 0x49d   :  { %v323_v40 = vpop.f32.mrf.mxu0 }
 0x4a5   :  { %v325_v41 = vpop.f32.mrf.mxu0 }
 0x4b1   :  { %v344_v42 = vpop.f32.mrf.mxu1 }
 0x4b2   :  { %v348_v43 = vpack.c.bf16 %v344_v42, %v323_v40 }
 0x4b4   :  { %435 = vmatmul.msk.bf16.vlgmr.msrb.gmra.mxu2 %vm119_vm0, %v348_v43 }
 0x4b9   :  { %v346_v44 = vpop.f32.mrf.mxu1 }
 0x537   :  { %v377_v45 = vpop.f32.mrf.mxu2 }
 0x538   :  { %v378_v46 = vadd.f32 %v377_v45, %v693_v7 }
 0x53a   :  { %382 = vst.msk [vmem:[#allocation11] sm:$0xff] %vm119_vm0, %v378_v46 }
 0x53f   :  { %v379_v47 = vpop.f32.mrf.mxu2 }
 0x540   :  { %v380_v48 = vadd.f32 %v379_v47, %v697_v10 }
 0x542   :  { %383 = vst.msk [vmem:[#allocation11 + $0x8] sm:$0xff] %vm119_vm0, %v380_v48 }
 0x543   :  { %396 = dma.vmem_to_hbm [thread:$0]  %s389_s19, 256, %s391_s22, [#allocation4], %s628_s11, %s628_s11, %s629_s12  }
 0x544   :  { %621 = dma.done.wait [#allocation4], 256  }
 0x545   :  { %622 = vsyncadd [#allocation4], 4294967040 }
 0x546   :  { %401 = vsyncpa [#allocation3], 1 }
 0x547   :  { %402 = vsyncpa [#allocation6], 1 }
 0x548   :  { %403 = vsyncpa [#allocation9], 1 }
 0x549   :  { %404 = vsyncpa [#allocation4], 1 }

</bundles_post_ra>
